<compile_context>
chip_gen: v7x
topology: tpu7x:2x2x1
jax: 0.10.0
libtpu: 0.0.40
codegen_flags: <defaults>
</compile_context>

<pallas_src>
import functools

import jax
import jax.numpy as jnp
from jax import lax
from jax.experimental import pallas as pl
from jax.experimental.pallas import tpu as pltpu


def mf_kernel(user_idx_ref, item_idx_ref, user_tab_ref, item_tab_ref, out_ref):
    """out[0,0] = sum_b sum_f user_tab[user_idx[b], f] * item_tab[item_idx[b], f]."""
    batch = user_idx_ref.shape[0]
    n_users = user_tab_ref.shape[0]
    n_items = item_tab_ref.shape[0]

    # One-hot gather matrices, built entirely on the VPU:
    # (B, 1) int32 index broadcast against a (B, n_rows) lane iota.
    u_onehot = (
        lax.broadcasted_iota(jnp.int32, (batch, n_users), 1) == user_idx_ref[...]
    ).astype(jnp.float32)
    i_onehot = (
        lax.broadcasted_iota(jnp.int32, (batch, n_items), 1) == item_idx_ref[...]
    ).astype(jnp.float32)

    # Row gather as two tiny MXU matmuls: (B, n_rows) @ (n_rows, F) -> (B, F).
    u = jnp.dot(
        u_onehot,
        user_tab_ref[...],
        preferred_element_type=jnp.float32,
        precision=lax.Precision.HIGHEST,
    )
    v = jnp.dot(
        i_onehot,
        item_tab_ref[...],
        preferred_element_type=jnp.float32,
        precision=lax.Precision.HIGHEST,
    )

    # Single VPU multiply + single global (XLU) reduce for the whole batch.
    out_ref[0, 0] = jnp.sum(u * v)


@functools.partial(jax.jit, static_argnames=())
def matrix_factorization_forward(user, item, user_factors, item_factors):
    """Equivalent of (user_factors(user) * item_factors(item)).sum() -> scalar f32."""
    batch = user.shape[0]
    # Batch along sublanes, index value broadcast along lanes -> no in-kernel transpose.
    uidx = user.astype(jnp.int32).reshape(batch, 1)
    iidx = item.astype(jnp.int32).reshape(batch, 1)

    out = pl.pallas_call(
        mf_kernel,
        out_shape=jax.ShapeDtypeStruct((1, 1), jnp.float32),
        in_specs=[
            pl.BlockSpec(memory_space=pltpu.MemorySpace.VMEM),  # user indices (B, 1)
            pl.BlockSpec(memory_space=pltpu.MemorySpace.VMEM),  # item indices (B, 1)
            pl.BlockSpec(memory_space=pltpu.MemorySpace.VMEM),  # user embedding table
            pl.BlockSpec(memory_space=pltpu.MemorySpace.VMEM),  # item embedding table
        ],
        out_specs=pl.BlockSpec(memory_space=pltpu.MemorySpace.SMEM),
    )(uidx, iidx, user_factors.astype(jnp.float32), item_factors.astype(jnp.float32))
    return out[0, 0]


if __name__ == "__main__":
    # Module shapes: Embedding(n_users, n_factors), Embedding(n_items, n_factors)
    n_users, n_items, n_factors = 32, 48, 20
    batch = 8

    key = jax.random.PRNGKey(0)
    k_uidx, k_iidx, k_utab, k_itab = jax.random.split(key, 4)

    # Deterministic "parameters" (nn.Embedding default init ~ N(0, 1))
    user_factors = jax.random.normal(k_utab, (n_users, n_factors), dtype=jnp.float32)
    item_factors = jax.random.normal(k_itab, (n_items, n_factors), dtype=jnp.float32)

    # Deterministic example inputs (index tensors, as in the PyTorch forward)
    user = jax.random.randint(k_uidx, (batch,), 0, n_users, dtype=jnp.int32)
    item = jax.random.randint(k_iidx, (batch,), 0, n_items, dtype=jnp.int32)

    out = jax.block_until_ready(
        matrix_factorization_forward(user, item, user_factors, item_factors)
    )

    # Pure-JAX reference (exact gather) for sanity.
    ref = jnp.sum(user_factors[user] * item_factors[item])
    assert jnp.allclose(out, ref, rtol=1e-5, atol=1e-5), (out, ref)

    print("KERNEL_OK")
</pallas_src>

<mosaic_0001>
module attributes {stable_mosaic.version = 11 : i64} {
  func.func @mf_kernel(%arg0: memref<8x1xi32, #tpu.memory_space<vmem>>, %arg1: memref<8x1xi32, #tpu.memory_space<vmem>>, %arg2: memref<32x20xf32, #tpu.memory_space<vmem>>, %arg3: memref<48x20xf32, #tpu.memory_space<vmem>>, %arg4: memref<1x1xf32, #tpu.memory_space<smem>>) attributes {dimension_semantics = [], scalar_prefetch = 0 : i64, scratch_operands = 0 : i64, tpu.core_type = #tpu.core_type<tc>} {
    %0 = tpu.iota {dimensions = array<i32: 1>} : vector<8x32xi32>
    %c0 = arith.constant 0 : index
    %c0_0 = arith.constant 0 : index
    %1 = vector.load %arg0[%c0, %c0_0] : memref<8x1xi32, #tpu.memory_space<vmem>>, vector<8x1xi32>
    %2 = vector.broadcast %1 : vector<8x1xi32> to vector<8x32xi32>
    %3 = arith.cmpi eq, %0, %2 : vector<8x32xi32>
    %4 = arith.extui %3 : vector<8x32xi1> to vector<8x32xi32>
    %5 = arith.sitofp %4 : vector<8x32xi32> to vector<8x32xf32>
    %6 = tpu.iota {dimensions = array<i32: 1>} : vector<8x48xi32>
    %c0_1 = arith.constant 0 : index
    %c0_2 = arith.constant 0 : index
    %7 = vector.load %arg1[%c0_1, %c0_2] : memref<8x1xi32, #tpu.memory_space<vmem>>, vector<8x1xi32>
    %8 = vector.broadcast %7 : vector<8x1xi32> to vector<8x48xi32>
    %9 = arith.cmpi eq, %6, %8 : vector<8x48xi32>
    %10 = arith.extui %9 : vector<8x48xi1> to vector<8x48xi32>
    %11 = arith.sitofp %10 : vector<8x48xi32> to vector<8x48xf32>
    %c0_3 = arith.constant 0 : index
    %c0_4 = arith.constant 0 : index
    %12 = vector.load %arg2[%c0_3, %c0_4] : memref<32x20xf32, #tpu.memory_space<vmem>>, vector<32x20xf32>
    %cst = arith.constant dense<0.000000e+00> : vector<8x20xf32>
    %13 = tpu.matmul %5, %12, %cst {dimension_numbers = #tpu.dot_dimension_numbers<[1], [0], [0], [1], [0, 0, 1, 1], [], []>, precision = #tpu.contract_precision<fp32>} : vector<8x32xf32>, vector<32x20xf32>, vector<8x20xf32> -> vector<8x20xf32>
    %c0_5 = arith.constant 0 : index
    %c0_6 = arith.constant 0 : index
    %14 = vector.load %arg3[%c0_5, %c0_6] : memref<48x20xf32, #tpu.memory_space<vmem>>, vector<48x20xf32>
    %cst_7 = arith.constant dense<0.000000e+00> : vector<8x20xf32>
    %15 = tpu.matmul %11, %14, %cst_7 {dimension_numbers = #tpu.dot_dimension_numbers<[1], [0], [0], [1], [0, 0, 1, 1], [], []>, precision = #tpu.contract_precision<fp32>} : vector<8x48xf32>, vector<48x20xf32>, vector<8x20xf32> -> vector<8x20xf32>
    %16 = arith.mulf %13, %15 : vector<8x20xf32>
    %17 = vector.shape_cast %16 : vector<8x20xf32> to vector<1x8x20xf32>
    %cst_8 = arith.constant dense<0.000000e+00> : vector<1xf32>
    %18 = vector.multi_reduction <add>, %17, %cst_8 [1, 2] : vector<1x8x20xf32> to vector<1xf32>
    %19 = vector.shape_cast %18 : vector<1xf32> to vector<1x1x1xf32>
    %20 = vector.extract %19[0, 0, 0] : f32 from vector<1x1x1xf32>
    %c0_9 = arith.constant 0 : index
    %c0_10 = arith.constant 0 : index
    %21 = memref.load %arg4[%c0_9, %c0_10] : memref<1x1xf32, #tpu.memory_space<smem>>
    memref.store %20, %arg4[%c0_9, %c0_10] : memref<1x1xf32, #tpu.memory_space<smem>>
    return
  }
}

</mosaic_0001>

<bundles_post_ra>
// kernel: matrix_factorization_forward.1
= control target key start
LH: loop header
LB: loop body
LE: loop exit
PB: predicated region body
PF: predicated region fallthrough
CT: control target
= control target key end

     0   :  { %v1440_v2 = vmov 0   ;;  %v1441_v3 = vmov 0.0|0.0   ;;  %s1747_s0 = inlined_call_operand.vmem [shape: s32[8,1], index: 0, kind: input, shape index: {}]   ;;  %s1748_s1 = inlined_call_operand.vmem [shape: s32[8,1], index: 1, kind: input, shape index: {}]   ;;  %s1749_s2 = inlined_call_operand.vmem [shape: f32[32,20], index: 2, kind: input, shape index: {}]   ;;  %s1750_s3 = inlined_call_operand.vmem [shape: f32[48,20], index: 3, kind: input, shape index: {}]   ;;  %s1751_s4 = inlined_call_operand.hbm [shape: f32[1,1], index: 4, kind: output, shape index: {}]  }
   0x1   :  { %v20_v0 = vld [vmem:[%s1747_s0] sm:$0xff]  ;;  %1427 = vset.pattern.permute.xlu0 %v1440_v2  ;;  %1356 = vmatprep.subr.bf16.mxu1 %v1441_v3  ;;  %v1482_v4 = vld [vmem:[%s1750_s3 + $0x8] sm:$0xff]  ;;  %v1488_v6 = vld [vmem:[%s1750_s3 + $0x10] sm:$0xff] }
   0x2   :  { %v1476_v1 = vld [vmem:[%s1750_s3] sm:$0xff]  ;;  %v1493_v7 = vld [vmem:[%s1750_s3 + $0x18] sm:$0xff]  ;;  %22 = vperm.xlu0 %1427, %v20_v0   ;;  %v541_v9 = vand.u32 4294901760, %v1482_v4  ;;  %v544_v10 = vand.u32 4294901760, %v1488_v6  ;;  %1311 = vmatprep.subr.bf16.mxu0 %v1441_v3  ;;  %v1510_v13 = vld [vmem:[%s1750_s3 + $0x28] sm:$0xff] }
   0x3   :  { %v538_v5 = vand.u32 4294901760, %v1476_v1  ;;  %v27_v8 = vld [vmem:[%s1748_s1] sm:$0xff]  ;;  %v547_v11 = vand.u32 4294901760, %v1493_v7  ;;  %v553_v16 = vand.u32 4294901760, %v1510_v13  ;;  %v35_v18 = vld [vmem:[%s1749_s2 + $0x8] sm:$0xff] }
   0x4   :  { %v1505_v12 = vld [vmem:[%s1750_s3 + $0x20] sm:$0xff] }
   0x5   :  { %v1515_v14 = vsub.f32 %v1476_v1, %v538_v5  ;;  %v550_v15 = vand.u32 4294901760, %v1505_v12  ;;  %v34_v17 = vld [vmem:[%s1749_s2] sm:$0xff] }
   0x6   :  { %9 = vsyncpa [#allocation3], 0  ;;  %v1528_v19 = vsub.f32 %v1482_v4, %v541_v9  ;;  %v1533_v20 = vsub.f32 %v1488_v6, %v544_v10  ;;  %v1538_v21 = vsub.f32 %v1493_v7, %v547_v11  ;;  %v43_v22 = vand.u32 4294901760, %v34_v17  ;;  %29 = vperm.xlu0 %1427, %v27_v8   ;;  %v36_v39 = vld [vmem:[%s1749_s2 + $0x10] sm:$0xff]  ;;  %v37_v42 = vld [vmem:[%s1749_s2 + $0x18] sm:$0xff]  ;;  %s1428_s12 = scalar_lea.hbm %s1751_s4, 16 }
   0x7   :  { %v621_v23 = vand.u32 4294901760, %v1515_v14  ;;  %v1544_v24 = vsub.f32 %v1505_v12, %v550_v15  ;;  %v1549_v25 = vsub.f32 %v1510_v13, %v553_v16  ;;  %v46_v26 = vand.u32 4294901760, %v35_v18  ;;  %p1429_p0 = scmp.ne.s32.totalorder %s1751_s4, %s1428_s12  ;;  %p1432_p1 = scmp.lt.u32.totalorder %s1428_s12, %s1751_s4 }
   0x8   :  { %v628_v27 = vand.u32 4294901760, %v1528_v19  ;;  %v635_v28 = vand.u32 4294901760, %v1533_v20  ;;  %v642_v29 = vand.u32 4294901760, %v1538_v21  ;;  %v1554_v30 = vsub.f32 %v34_v17, %v43_v22 }
   0x9   :  { %v622_v31 = vsub.f32 %v1515_v14, %v621_v23  ;;  %v649_v32 = vand.u32 4294901760, %v1544_v24  ;;  %v656_v33 = vand.u32 4294901760, %v1549_v25  ;;  %v1561_v34 = vpack.c.bf16 %v46_v26, %v43_v22  ;;  %p1434_p2 = pnand %p1432_p1, %p1429_p0 }
   0xa   :  { %v629_v35 = vsub.f32 %v1528_v19, %v628_v27  ;;  %v636_v36 = vsub.f32 %v1533_v20, %v635_v28  ;;  %v643_v37 = vsub.f32 %v1538_v21, %v642_v29  ;;  %v1572_v38 = vsub.f32 %v35_v18, %v46_v26 }
   0xb   :  { %v623_v40 = vand.u32 4294901760, %v622_v31  ;;  %v650_v41 = vsub.f32 %v1544_v24, %v649_v32  ;;  %1313 = vmatpush3.bf16.msra.mxu0 %v1561_v34  ;;  %v657_v46 = vsub.f32 %v1549_v25, %v656_v33  ;;  %vm1442_vm0 = vmmov 0  }
   0xc   :  { %v630_v43 = vand.u32 4294901760, %v629_v35  ;;  %v637_v44 = vand.u32 4294901760, %v636_v36  ;;  %v644_v45 = vand.u32 4294901760, %v643_v37  ;;  %v1443_v47 = vmov 0.0   ;;  %1314 = vmatprep.subr.bf16.mxu0 %v1441_v3 }
   0xd   :  { %1248 = vmatprep.mubr.msk.f32.mxu1 %vm1442_vm0, %v1443_v47  ;;  %v1366_v48 = vpack.c.bf16 %v1528_v19, %v1515_v14  ;;  %v49_v49 = vand.u32 4294901760, %v36_v39  ;;  %1163 = vmatprep.mubr.msk.f32.mxu0 %vm1442_vm0, %v1443_v47  ;;  %v52_v51 = vand.u32 4294901760, %v37_v42  ;;  %v1369_v52 = vpack.c.bf16 %v1538_v21, %v1533_v20 }
   0xe   :  { %v1357_v50 = vpack.c.bf16 %v630_v43, %v623_v40  ;;  %v651_v53 = vand.u32 4294901760, %v650_v41  ;;  %v124_v55 = vand.u32 4294901760, %v1554_v30  ;;  %v131_v56 = vand.u32 4294901760, %v1572_v38 }
   0xf   :  { %v1596_v54 = vsub.f32 %v36_v39, %v49_v49  ;;  %v1360_v57 = vpack.c.bf16 %v644_v45, %v637_v44  ;;  %v658_v58 = vand.u32 4294901760, %v657_v46  ;;  %v1600_v59 = vpack.c.bf16 %v52_v51, %v49_v49 }
  0x10   :  { %1358 = vmatpush3.bf16.msra.mxu1 %v1357_v50  ;;  %v1602_v60 = vsub.f32 %v37_v42, %v52_v51  ;;  %v125_v61 = vsub.f32 %v1554_v30, %v124_v55  ;;  %v132_v62 = vsub.f32 %v1572_v38, %v131_v56  ;;  %v1372_v63 = vpack.c.bf16 %v1549_v25, %v1544_v24 }
  0x11   :  { %1359 = vmatprep.subr.bf16.mxu1 %v1441_v3  ;;  %v138_v0 = vand.u32 4294901760, %v1596_v54  ;;  %1316 = vmatpush3.bf16.msra.mxu0 %v1600_v59  ;;  %v1363_v22 = vpack.c.bf16 %v658_v58, %v651_v53  ;;  %v1620_v36 = vpack.c.bf16 %v541_v9, %v538_v5  ;;  %v1324_v39 = vpack.c.bf16 %v1572_v38, %v1554_v30 }
  0x12   :  { %v145_v2 = vand.u32 4294901760, %v1602_v60  ;;  %1317 = vmatprep.subr.bf16.mxu0 %v1441_v3  ;;  %v126_v8 = vand.u32 4294901760, %v125_v61  ;;  %v133_v17 = vand.u32 4294901760, %v132_v62  ;;  %v1629_v41 = vpack.c.bf16 %v547_v11, %v544_v10 }
  0x13   :  { %v139_v18 = vsub.f32 %v1596_v54, %v138_v0  ;;  %v1327_v1 = vpack.c.bf16 %v1602_v60, %v1596_v54  ;;  %v1637_v4 = vpack.c.bf16 %v553_v16, %v550_v15  ;;  %v1384_v5 = vpack.c.bf16 %v628_v27, %v621_v23 }
  0x14   :  { %1361 = vmatpush3.bf16.msra.mxu1 %v1360_v57  ;;  %v146_v26 = vsub.f32 %v1602_v60, %v145_v2  ;;  %v1318_v31 = vpack.c.bf16 %v133_v17, %v126_v8  ;;  %v1387_v6 = vpack.c.bf16 %v642_v29, %v635_v28  ;;  %v1336_v7 = vpack.c.bf16 %v131_v56, %v124_v55 }
  0x15   :  { %1362 = vmatprep.subr.bf16.mxu1 %v1441_v3  ;;  %v140_v35 = vand.u32 4294901760, %v139_v18  ;;  %v1651_v9 = vpack.c.bf16 %v656_v33, %v649_v32  ;;  %v1653_v10 = vpack.c.bf16 %v145_v2, %v138_v0  ;;  %v18_v11 = vlaneseq }
  0x16   :  { %v147_v37 = vand.u32 4294901760, %v146_v26  ;;  %vm38_vm1 = vcmask 261120   ;;  %vm533_vm3 = vcmask 392192   ;;  %vm1049_vm5 = vcmask 162816  }
  0x17   :  { %v19_v12 = vand.u32 127, %v18_v11 }
  0x18   :  { %1364 = vmatpush3.bf16.msra.mxu1 %v1363_v22  ;;  %v1321_v40 = vpack.c.bf16 %v147_v37, %v140_v35 }
  0x19   :  { %1365 = vmatprep.subr.bf16.mxu1 %v1441_v3 }
  0x81   :  { %v23_v13 = vpop.permute.xlu0 %22 }
  0x82   :  { %vm24_vm2 = vcmp.eq.s32.totalorder %v19_v12, %v23_v13 }
  0x83   :  { %v1656_v14 = vsel %vm24_vm2, 1.0, %v1443_v47 }
  0x84   :  { %v40_v15 = vsel %vm38_vm1, %v1656_v14, 0 }
  0x85   :  { %v112_v16 = vsub.f32 %v40_v15, %v40_v15  ;;  %v30_v19 = vpop.permute.xlu0 %29 }
  0x86   :  { %vm31_vm4 = vcmp.eq.s32.totalorder %v19_v12, %v30_v19 }
  0x87   :  { %v1661_v20 = vsel %vm31_vm4, 1.0, %v1443_v47  ;;  %v113_v21 = vand.u32 4294901760, %v112_v16 }
  0x88   :  { %1249 = vmatmul.mubr.msk.f32.vlgmr.msra.gmra.mrb[0].mxu1 %vm533_vm3, %v1661_v20  ;;  %v535_v25 = vsel %vm533_vm3, %v1661_v20, 0 }
  0x89   :  { %1367 = vmatpush3.bf16.msra.mxu1 %v1366_v48  ;;  %v114_v23 = vsub.f32 %v112_v16, %v113_v21  ;;  %1263 = vmatprep.mubr.msk.f32.mxu1 %vm1442_vm0, %v1443_v47  ;;  %v609_v27 = vsub.f32 %v535_v25, %v535_v25 }
  0x8a   :  { %1368 = vmatprep.subr.bf16.mxu1 %v1441_v3 }
  0x8b   :  { %v115_v24 = vand.u32 4294901760, %v114_v23  ;;  %v610_v28 = vand.u32 4294901760, %v609_v27 }
  0x8d   :  { %1370 = vmatpush3.bf16.msra.mxu1 %v1369_v52  ;;  %1164 = vmatmul.mubr.f32.vlgmr.msra.gmra.mrb[0].mxu0 %v115_v24  ;;  %v611_v29 = vsub.f32 %v609_v27, %v610_v28 }
  0x8e   :  { %1319 = vmatpush3.bf16.msra.mxu0 %v1318_v31  ;;  %1371 = vmatprep.subr.bf16.mxu1 %v1441_v3 }
  0x8f   :  { %1320 = vmatprep.subr.bf16.mxu0 %v1441_v3  ;;  %1174 = vmatprep.mubr.msk.f32.mxu0 %vm1442_vm0, %v1443_v47  ;;  %v612_v30 = vand.u32 4294901760, %v611_v29 }
  0x91   :  { %1373 = vmatpush3.bf16.msra.mxu1 %v1372_v63 }
  0x92   :  { %1322 = vmatpush3.bf16.msra.mxu0 %v1321_v40  ;;  %1374 = vmatprep.subr.bf16.mxu1 %v1441_v3 }
  0x93   :  { %1323 = vmatprep.subr.bf16.mxu0 %v1441_v3 }
  0x94   :  { %1264 = vmatmul.mubr.f32.vlgmr.msra.gmra.mrb[0].mxu1 %v609_v27 }
  0x95   :  { %1376 = vmatpush3.bf16.msra.mxu1 %v1620_v36  ;;  %1175 = vmatmul.mubr.msk.f32.vlgmr.msra.gmra.mrb[0].mxu0 %vm38_vm1, %v1656_v14 }
  0x96   :  { %1325 = vmatpush3.bf16.msra.mxu0 %v1324_v39  ;;  %1377 = vmatprep.subr.bf16.mxu1 %v1441_v3 }
  0x97   :  { %1326 = vmatprep.subr.bf16.mxu0 %v1441_v3  ;;  %1185 = vmatprep.mubr.msk.f32.mxu0 %vm1442_vm0, %v1443_v47 }
  0x98   :  { %1278 = vmatprep.mubr.msk.f32.mxu1 %vm1442_vm0, %v1443_v47 }
  0x99   :  { %1379 = vmatpush3.bf16.msra.mxu1 %v1629_v41 }
  0x9a   :  { %1328 = vmatpush3.bf16.msra.mxu0 %v1327_v1  ;;  %1380 = vmatprep.subr.bf16.mxu1 %v1441_v3 }
  0x9b   :  { %1329 = vmatprep.subr.bf16.mxu0 %v1441_v3 }
  0x9d   :  { %1382 = vmatpush3.bf16.msra.mxu1 %v1637_v4  ;;  %1186 = vmatmul.mubr.f32.vlgmr.msra.gmra.mrb[0].mxu0 %v112_v16 }
  0x9e   :  { %1331 = vmatpush3.bf16.msra.mxu0 %v1561_v34  ;;  %1383 = vmatprep.subr.bf16.mxu1 %v1441_v3 }
  0x9f   :  { %1332 = vmatprep.subr.bf16.mxu0 %v1441_v3  ;;  %1196 = vmatprep.mubr.msk.f32.mxu0 %vm1442_vm0, %v1443_v47 }
  0xa0   :  { %1279 = vmatmul.mubr.f32.vlgmr.msra.gmra.mrb[0].mxu1 %v610_v28 }
  0xa1   :  { %1385 = vmatpush3.bf16.msra.mxu1 %v1384_v5  ;;  %1293 = vmatprep.mubr.msk.f32.mxu1 %vm1442_vm0, %v1443_v47 }
  0xa2   :  { %1334 = vmatpush3.bf16.msra.mxu0 %v1600_v59  ;;  %1386 = vmatprep.subr.bf16.mxu1 %v1441_v3 }
  0xa3   :  { %1335 = vmatprep.subr.bf16.mxu0 %v1441_v3 }
  0xa5   :  { %1388 = vmatpush3.bf16.msra.mxu1 %v1387_v6  ;;  %1197 = vmatmul.mubr.f32.vlgmr.msra.gmra.mrb[0].mxu0 %v113_v21 }
  0xa6   :  { %1337 = vmatpush3.bf16.msra.mxu0 %v1336_v7  ;;  %1389 = vmatprep.subr.bf16.mxu1 %v1441_v3 }
  0xa7   :  { %1338 = vmatprep.subr.bf16.mxu0 %v1441_v3  ;;  %1207 = vmatprep.mubr.msk.f32.mxu0 %vm1442_vm0, %v1443_v47 }
  0xa9   :  { %1391 = vmatpush3.bf16.msra.mxu1 %v1651_v9 }
  0xaa   :  { %1340 = vmatpush3.bf16.msra.mxu0 %v1653_v10  ;;  %1392 = vmatprep.subr.bf16.mxu1 %v1441_v3 }
  0xab   :  { %1341 = vmatprep.subr.bf16.mxu0 %v1441_v3 }
  0xac   :  { %1294 = vmatmul.mubr.msk.f32.vlgmr.msra.gmra.mrb[0].mxu1 %vm533_vm3, %v1661_v20 }
  0xad   :  { %1394 = vmatpush3.bf16.msra.mxu1 %v1620_v36  ;;  %1208 = vmatmul.mubr.msk.f32.vlgmr.msra.gmra.mrb[0].mxu0 %vm38_vm1, %v1656_v14 }
  0xae   :  { %1343 = vmatpush3.bf16.msra.mxu0 %v1561_v34  ;;  %1395 = vmatprep.subr.bf16.mxu1 %v1441_v3 }
  0xaf   :  { %1344 = vmatprep.subr.bf16.mxu0 %v1441_v3  ;;  %1218 = vmatprep.mubr.msk.f32.mxu0 %vm1442_vm0, %v1443_v47 }
  0xb0   :  { %1308 = vmatprep.mubr.msk.f32.mxu1 %vm1442_vm0, %v1443_v47 }
  0xb1   :  { %1397 = vmatpush3.bf16.msra.mxu1 %v1629_v41 }
  0xb2   :  { %1346 = vmatpush3.bf16.msra.mxu0 %v1600_v59  ;;  %1398 = vmatprep.subr.bf16.mxu1 %v1441_v3 }
  0xb3   :  { %1347 = vmatprep.subr.bf16.mxu0 %v1441_v3 }
  0xb5   :  { %1400 = vmatpush3.bf16.msra.mxu1 %v1637_v4  ;;  %1219 = vmatmul.mubr.msk.f32.vlgmr.msra.gmra.mrb[0].mxu0 %vm38_vm1, %v1656_v14 }
  0xb6   :  { %1349 = vmatpush3.bf16.msra.mxu0 %v1620_v36  ;;  %1233 = vmatprep.mubr.msk.f32.mxu0 %vm1442_vm0, %v1443_v47 }
  0xb7   :  { %1350 = vmatprep.subr.bf16.mxu0 %v1441_v3 }
  0xb8   :  { %1309 = vmatmul.mubr.msk.f32.vlgmr.msra.gmra.mrb[0].mxu1 %vm533_vm3, %v1661_v20 }
  0xba   :  { %1352 = vmatpush3.bf16.msra.mxu0 %v1629_v41 }
  0xbb   :  { %1353 = vmatprep.subr.bf16.mxu0 %v1441_v3 }
  0xbe   :  { %1355 = vmatpush3.bf16.msra.mxu0 %v1637_v4 }
  0xc1   :  { %1234 = vmatmul.mubr.f32.vlgmr.msra.gmra.mrb[2].mxu0 %v612_v30 }
 0x188   :  { %v523_v32 = vpop.f32.mrb[0].mxu0 }
 0x189   :  { %v1220_v33 = vpop.f32.mrb[1].mxu0 }
 0x18b   :  { %v1044_v34 = vpop.f32.mrb[0].mxu1 }
 0x18c   :  { %v1310_v38 = vpop.f32.mrb[1].mxu1 }
 0x194   :  { %v614_v42 = vpop.f32.mrb[2].mxu0 }
 0x195   :  { %v1401_v43 = vadd.f32 %v1044_v34, %v614_v42  ;;  %v1235_v44 = vpop.f32.mrb[3].mxu0 }
 0x197   :  { %v1048_v45 = vmul.f32 %v1401_v43, %v523_v32 }
 0x199   :  { %v1050_v46 = vsel %vm1049_vm5, %v1048_v45, 0.0 }
 0x19a   :  { %1051 = vadd.xlane.f32.xlu1 %v1050_v46 }
 0x227   :  { %v1052_v47 = vpop.xlane.xlu1 %1051 }
 0x228   :  { %v1053_v48 = vrot.slane %v1052_v47, 4 }
 0x22a   :  { %v1054_v49 = vadd.f32 %v1053_v48, %v1052_v47 }
 0x22c   :  { %v1055_v3 = vrot.slane %v1054_v49, 2 }
 0x22e   :  { %v1056_v50 = vadd.f32 %v1055_v3, %v1054_v49 }
 0x230   :  { %v1057_v51 = vrot.slane %v1056_v50, 1 }
 0x232   :  { %v1058_v52 = vadd.f32 %v1057_v51, %v1056_v50 }
 0x234   :  { %1420 = vpush %v1058_v52 }
 0x265   :  { %s1421_s2 = spop %1420 }
 0x266   :  { %1061 = sst [smem:[#allocation2]] %s1421_s2 }
 0x267   :  { %1437 = shalt.err (!%p1434_p2)
}
 0x268   :  { %s1444_s17 = smov [#allocation2]  }
 0x269   :  { %1069 = dma.smem_to_hbm %s1444_s17, 16, %s1751_s4, [#allocation3]  }
 0x26a   :  { %1438 = dma.done.wait [#allocation3], 16  }
 0x26b   :  { %1439 = vsyncadd [#allocation3], 4294967280 }
 0x26c   :  { %1073 = sfence }
 0x26d   :  { %1074 = vsyncpa [#allocation3], 1 }

</bundles_post_ra>
